<compile_context>
chip_gen: v7x
topology: tpu7x:2x2x1
jax: 0.10.0
libtpu: 0.0.40
codegen_flags: <defaults>
</compile_context>

<pallas_src>
import functools

import numpy as np

import jax
import jax.numpy as jnp
from jax.experimental import pallas as pl
from jax.experimental.pallas import tpu as pltpu


# --------------------------- shared attention math --------------------------


def _mha_heads(q, k, v, bias_row, *, heads, dim_head, scale, mxu_dtype):
    """Multi-head attention on one (query-tile, full-KV) pair.

    q: (tq, inner); k, v: (n, inner); bias_row: (1, n) fp32 additive.
    Returns the concatenated head outputs, shape (tq, inner), fp32.
    Scores / softmax / bias stay strictly fp32; only MXU operands are cast.
    """
    # Fold the softmax scale into q once (tq*inner mults instead of a tq*N
    # VPU multiply per head on the score matrix).
    q = (q.astype(jnp.float32) * scale).astype(mxu_dtype)
    k = k.astype(mxu_dtype)
    v = v.astype(mxu_dtype)

    outs = []
    # TODO(synk): for heads >> 8, restructure as a lax.fori_loop / lane-packed
    # score slab; at heads <= 8 the unrolled loop with short-lived per-head
    # temporaries (no N*N arrays kept live) is fine.
    for h in range(heads):
        lo = h * dim_head
        hi = lo + dim_head
        s = jnp.einsum("qd,kd->qk", q[:, lo:hi], k[:, lo:hi],
                       preferred_element_type=jnp.float32)
        s = s + bias_row                     # (1, n) broadcasts along sublanes
        s = s - jnp.max(s, axis=-1, keepdims=True)
        p = jnp.exp(s)
        p = p * pl.reciprocal(jnp.sum(p, axis=-1, keepdims=True), approx=True)
        outs.append(jnp.dot(p.astype(mxu_dtype), v[:, lo:hi],
                            preferred_element_type=jnp.float32))
    return jnp.concatenate(outs, axis=-1)    # (tq, inner) fp32


# ----------------------------- kernels --------------------------------------


def _fused_kernel(x_ref, wqkv_ref, bias_ref, wout_ref, bout_ref, o_ref, *,
                  heads, dim_head, scale, mxu_dtype):
    """One batch per step: QKV projection + attention + output projection."""
    inner = heads * dim_head
    x = x_ref[0].astype(mxu_dtype)                          # (n, dim)
    qkv = jnp.dot(x, wqkv_ref[...].astype(mxu_dtype),
                  preferred_element_type=jnp.float32)       # (n, 3*inner) fp32
    o = _mha_heads(qkv[:, :inner], qkv[:, inner:2 * inner], qkv[:, 2 * inner:],
                   bias_ref[0], heads=heads, dim_head=dim_head, scale=scale,
                   mxu_dtype=mxu_dtype)
    out = jnp.dot(o.astype(mxu_dtype), wout_ref[...].astype(mxu_dtype),
                  preferred_element_type=jnp.float32)       # one K=inner matmul
    o_ref[0] = (out + bout_ref[...]).astype(o_ref.dtype)


def _qkv_proj_kernel(x_ref, w_ref, o_ref):
    """One row tile of x against the whole (dim, 3*inner) weight slab."""
    o_ref[...] = jnp.dot(x_ref[...], w_ref[...],
                         preferred_element_type=jnp.float32).astype(o_ref.dtype)


def _attn_kernel(qsrc_ref, kvsrc_ref, bias_ref, wout_ref, bout_ref, o_ref, *,
                 heads, dim_head, scale, mxu_dtype):
    """One (batch, query-tile) per step; K/V cover the full sequence."""
    inner = heads * dim_head
    q = qsrc_ref[0, :, :inner]
    k = kvsrc_ref[0, :, inner:2 * inner]
    v = kvsrc_ref[0, :, 2 * inner:]
    o = _mha_heads(q, k, v, bias_ref[0], heads=heads, dim_head=dim_head,
                   scale=scale, mxu_dtype=mxu_dtype)
    out = jnp.dot(o.astype(mxu_dtype), wout_ref[...].astype(mxu_dtype),
                  preferred_element_type=jnp.float32)
    o_ref[0] = (out + bout_ref[...]).astype(o_ref.dtype)


# ----------------------------- helpers --------------------------------------


def _compiler_params(semantics, est_bytes):
    kwargs = dict(dimension_semantics=semantics)
    # Only raise the scoped VMEM limit when the estimate says we need it
    # (cap at v7x's 64 MiB physical; v5e/v6e have 128 MiB so this is safe).
    if est_bytes > (16 << 20):
        kwargs["vmem_limit_bytes"] = int(min(max(2 * est_bytes, 32 << 20),
                                             64 << 20))
    return pltpu.CompilerParams(**kwargs)


def _fused_step_bytes(n, dim, inner, itemsize, out_itemsize):
    dbl = 2  # BlockSpec pipelining double-buffers each block by default.
    stream = dbl * n * (dim * itemsize + dim * out_itemsize + 4)    # x, out, bias
    resident = dbl * (dim * 3 * inner + inner * dim) * itemsize + dbl * dim * 4
    temps = 4 * (n * 3 * inner + 3 * n * n + n * inner)             # fp32 qkv/s/p/o
    return stream + resident + temps


# ----------------------------- wrappers --------------------------------------


def _fused_forward(x, w_qkv, bias, w_out, b_out, *, heads, dim_head, scale,
                   mxu_dtype, out_dtype):
    B, N, dim = x.shape
    inner = w_out.shape[0]
    three_inner = w_qkv.shape[1]
    kernel = functools.partial(_fused_kernel, heads=heads, dim_head=dim_head,
                               scale=scale, mxu_dtype=mxu_dtype)
    est = _fused_step_bytes(N, dim, inner, x.dtype.itemsize,
                            np.dtype(out_dtype).itemsize)
    return pl.pallas_call(
        kernel,
        grid=(B,),
        in_specs=[pl.BlockSpec((1, N, dim), lambda b: (b, 0, 0)),
                  pl.BlockSpec((dim, three_inner), lambda b: (0, 0)),
                  pl.BlockSpec((1, 1, N), lambda b: (b, 0, 0)),
                  pl.BlockSpec((inner, dim), lambda b: (0, 0)),
                  pl.BlockSpec((1, dim), lambda b: (0, 0))],
        out_specs=pl.BlockSpec((1, N, dim), lambda b: (b, 0, 0)),
        out_shape=jax.ShapeDtypeStruct((B, N, dim), out_dtype),
        compiler_params=_compiler_params(("parallel",), est),
    )(x, w_qkv, bias, w_out, b_out)


def _qkv_projection(x2d, w_qkv, *, block_m):
    """x2d: (M, dim); w_qkv: (dim, 3*inner) -> (M, 3*inner) lane-dense output."""
    M, dim = x2d.shape
    three_inner = w_qkv.shape[1]
    tm = M if M <= block_m else max(8, (block_m // 8) * 8)
    grid = (pl.cdiv(M, tm),)
    itemsize = x2d.dtype.itemsize
    est = 2 * tm * (dim + three_inner) * itemsize + 2 * dim * three_inner * itemsize
    return pl.pallas_call(
        _qkv_proj_kernel,
        grid=grid,
        in_specs=[pl.BlockSpec((tm, dim), lambda i: (i, 0)),
                  pl.BlockSpec((dim, three_inner), lambda i: (0, 0))],
        out_specs=pl.BlockSpec((tm, three_inner), lambda i: (i, 0)),
        out_shape=jax.ShapeDtypeStruct((M, three_inner), x2d.dtype),
        compiler_params=_compiler_params(("parallel",), est),
    )(x2d, w_qkv)


def _attention(qkv, bias, w_out, b_out, *, heads, dim_head, scale, mxu_dtype,
               out_dtype, max_tq=256):
    """qkv: (B, N, 3*inner); bias: (B, 1, N) fp32; returns (B, N, dim)."""
    B, N, three_inner = qkv.shape
    inner = three_inner // 3
    dim = w_out.shape[1]
    tq = N if N <= max_tq else max_tq          # tq == N or tq % 8 == 0
    grid = (B, pl.cdiv(N, tq))
    kernel = functools.partial(_attn_kernel, heads=heads, dim_head=dim_head,
                               scale=scale, mxu_dtype=mxu_dtype)
    itemsize = qkv.dtype.itemsize
    est = (2 * (tq + N) * three_inner * itemsize            # q tile + KV block
           + 2 * N * 4 + 2 * inner * dim * itemsize + 2 * dim * 4
           + 2 * tq * dim * np.dtype(out_dtype).itemsize
           + 4 * (3 * tq * N + tq * inner))                 # fp32 temporaries
    return pl.pallas_call(
        kernel,
        grid=grid,
        in_specs=[pl.BlockSpec((1, tq, three_inner), lambda b, qi: (b, qi, 0)),
                  pl.BlockSpec((1, N, three_inner), lambda b, qi: (b, 0, 0)),
                  pl.BlockSpec((1, 1, N), lambda b, qi: (b, 0, 0)),
                  pl.BlockSpec((inner, dim), lambda b, qi: (0, 0)),
                  pl.BlockSpec((1, dim), lambda b, qi: (0, 0))],
        out_specs=pl.BlockSpec((1, tq, dim), lambda b, qi: (b, qi, 0)),
        out_shape=jax.ShapeDtypeStruct((B, N, dim), out_dtype),
        compiler_params=_compiler_params(("parallel", "parallel"), est),
    )(qkv, qkv, bias, w_out, b_out)


def self_attention_forward(x, params, heads, mask=None, mxu_dtype=None,
                           fuse_qkv=None, block_m=512):
    """Pallas-backed SelfAttention.forward.

    x:    (B, N, dim)
    mask: optional (B, N) bool; True = attend (matches attn_mask semantics).
    mxu_dtype: optional lower-precision MXU operand dtype (e.g. jnp.bfloat16);
               accumulation / softmax / bias stay fp32.
    fuse_qkv: None = auto (fuse when the per-batch footprint is small).
    """
    B, N, dim = x.shape
    w_qkv = params["w_qkv"]    # (dim, 3*inner) = to_qkv.weight.T
    w_out = params["w_out"]    # (inner, dim)   = to_out[0].weight.T
    b_out = params["b_out"]    # (dim,)
    inner = w_out.shape[0]
    dh = inner // heads
    scale = dh ** (-0.5)
    out_dtype = x.dtype
    compute_dtype = out_dtype if mxu_dtype is None else mxu_dtype

    # Only a (B, 1, N) fp32 bias row is ever materialized (never (B*h, N, N)).
    if mask is None:
        bias = jnp.zeros((B, 1, N), jnp.float32)
    else:
        bias = jnp.where(mask, 0.0, -1e30).astype(jnp.float32).reshape(B, 1, N)
    # NOTE: a fully-masked query row yields a uniform softmax (finite -1e30),
    # whereas torch's -inf mask would produce NaN there.

    w_qkv_c = w_qkv.astype(compute_dtype)     # whole slab; torch chunk order q|k|v
    w_out_c = w_out.astype(compute_dtype)
    b_out_c = b_out.astype(jnp.float32).reshape(1, dim)
    x_c = x.astype(compute_dtype)

    if fuse_qkv is None:
        itemsize = np.dtype(compute_dtype).itemsize
        fuse_qkv = (N <= 256 and _fused_step_bytes(
            N, dim, inner, itemsize, np.dtype(out_dtype).itemsize) <= (8 << 20))

    if fuse_qkv:
        # Single kernel: QKV + attention + output projection per batch (no
        # (B, N, 3*inner) HBM round trip, one launch).
        return _fused_forward(x_c, w_qkv_c, bias, w_out_c, b_out_c,
                              heads=heads, dim_head=dh, scale=scale,
                              mxu_dtype=compute_dtype, out_dtype=out_dtype)

    # Two-kernel path: lane-dense row-tiled QKV projection, then q-tiled
    # attention + fused output projection (layout stays (B, N, 3*inner); no
    # XLA transposes anywhere).
    qkv = _qkv_projection(x_c.reshape(B * N, dim), w_qkv_c, block_m=block_m)
    qkv = qkv.reshape(B, N, 3 * inner)
    return _attention(qkv, bias, w_out_c, b_out_c, heads=heads, dim_head=dh,
                      scale=scale, mxu_dtype=compute_dtype, out_dtype=out_dtype)


# ----------------------------- reference -------------------------------------


def _reference(x, params, heads, mask=None):
    B, N, dim = x.shape
    w_qkv, w_out, b_out = params["w_qkv"], params["w_out"], params["b_out"]
    inner = w_out.shape[0]
    dh = inner // heads
    scale = dh ** (-0.5)
    qkv = x @ w_qkv
    qkv = qkv.reshape(B, N, 3, heads, dh)
    q = qkv[:, :, 0].transpose(0, 2, 1, 3).reshape(B * heads, N, dh)
    k = qkv[:, :, 1].transpose(0, 2, 1, 3).reshape(B * heads, N, dh)
    v = qkv[:, :, 2].transpose(0, 2, 1, 3).reshape(B * heads, N, dh)
    s = jnp.einsum("bnd,bmd->bnm", q, k) * scale
    if mask is not None:
        m = jnp.broadcast_to(mask[:, None, :], (B, N, N))
        s = s + jnp.repeat(jnp.where(m, 0.0, -1e30), heads, axis=0)
    p = jax.nn.softmax(s, axis=-1)
    out = jnp.einsum("bnm,bmd->bnd", p, v)
    out = out.reshape(B, heads, N, dh).transpose(0, 2, 1, 3).reshape(B, N, inner)
    return out @ w_out + b_out


# ------------------------------- main ----------------------------------------

if __name__ == "__main__":
    B, N, dim = 2, 8, 32
    heads, dim_head = 4, 16
    inner = heads * dim_head

    key = jax.random.PRNGKey(0)
    kx, kqkv, kw, kb, km = jax.random.split(key, 5)

    x = jax.random.normal(kx, (B, N, dim), dtype=jnp.float32)
    params = {
        # nn.Linear(dim, 3*inner, bias=False).weight.T
        "w_qkv": jax.random.normal(kqkv, (dim, 3 * inner), jnp.float32) * 0.05,
        # nn.Linear(inner, dim).weight.T and bias
        "w_out": jax.random.normal(kw, (inner, dim), jnp.float32) * 0.05,
        "b_out": jax.random.normal(kb, (dim,), jnp.float32) * 0.05,
    }
    mask = jax.random.bernoulli(km, 0.7, (B, N))
    mask = mask.at[:, 0].set(True)  # ensure every query attends to something

    ref = _reference(x, params, heads, mask=mask)

    # 1) fused path (auto-selected at these shapes), fp32.  Tolerance covers
    #    the EUP approx-reciprocal softmax normalization.
    out = jax.block_until_ready(self_attention_forward(x, params, heads, mask=mask))
    assert out.shape == (B, N, dim)
    assert jnp.allclose(out, ref, atol=5e-3, rtol=5e-3), "fused fp32 mismatch"

    # 2) no-mask path.
    ref_nm = _reference(x, params, heads, mask=None)
    out_nm = jax.block_until_ready(self_attention_forward(x, params, heads, mask=None))
    assert jnp.allclose(out_nm, ref_nm, atol=5e-3, rtol=5e-3), "no-mask mismatch"

    # 3) split (two-kernel) path with a small row tile to exercise the
    #    QKV-projection grid pipeline and the q-tiled attention kernel.
    out_sp = jax.block_until_ready(
        self_attention_forward(x, params, heads, mask=mask, fuse_qkv=False,
                               block_m=8))
    assert jnp.allclose(out_sp, ref, atol=5e-3, rtol=5e-3), "split-path mismatch"

    # 4) bf16 MXU-operand path (fp32 accumulation / softmax / bias).
    out_bf16 = jax.block_until_ready(
        self_attention_forward(x, params, heads, mask=mask,
                               mxu_dtype=jnp.bfloat16))
    assert jnp.allclose(out_bf16, ref, atol=3e-2, rtol=3e-2), "bf16 mismatch"

    print("KERNEL_OK")
</pallas_src>

<mosaic_0001>
module attributes {stable_mosaic.version = 11 : i64} {
  func.func @_fused_kernel(%arg0: i32, %arg1: memref<1x8x32xf32, #tpu.memory_space<vmem>>, %arg2: memref<32x192xf32, #tpu.memory_space<vmem>>, %arg3: memref<1x1x8xf32, #tpu.memory_space<vmem>>, %arg4: memref<64x32xf32, #tpu.memory_space<vmem>>, %arg5: memref<1x32xf32, #tpu.memory_space<vmem>>, %arg6: memref<1x8x32xf32, #tpu.memory_space<vmem>>) attributes {dimension_semantics = [#tpu.dimension_semantics<parallel>], iteration_bounds = array<i64: 2>, scalar_prefetch = 0 : i64, scratch_operands = 0 : i64, tpu.core_type = #tpu.core_type<tc>, window_params = [{transform_indices = @transform_0, window_bounds = array<i64: 1, 8, 32>}, {pipeline_mode = #tpu.pipeline_mode<synchronous>, transform_indices = @transform_1, window_bounds = array<i64: 32, 192>}, {transform_indices = @transform_2, window_bounds = array<i64: 1, 1, 8>}, {pipeline_mode = #tpu.pipeline_mode<synchronous>, transform_indices = @transform_3, window_bounds = array<i64: 64, 32>}, {pipeline_mode = #tpu.pipeline_mode<synchronous>, transform_indices = @transform_4, window_bounds = array<i64: 1, 32>}, {transform_indices = @transform_5, window_bounds = array<i64: 1, 8, 32>}]} {
    %c0 = arith.constant 0 : index
    %c0_0 = arith.constant 0 : index
    %c0_1 = arith.constant 0 : index
    %0 = vector.load %arg1[%c0, %c0_0, %c0_1] : memref<1x8x32xf32, #tpu.memory_space<vmem>>, vector<1x8x32xf32>
    %1 = vector.shape_cast %0 : vector<1x8x32xf32> to vector<8x32xf32>
    %c0_2 = arith.constant 0 : index
    %c0_3 = arith.constant 0 : index
    %2 = vector.load %arg2[%c0_2, %c0_3] : memref<32x192xf32, #tpu.memory_space<vmem>>, vector<32x192xf32>
    %cst = arith.constant dense<0.000000e+00> : vector<8x192xf32>
    %3 = tpu.matmul %1, %2, %cst {dimension_numbers = #tpu.dot_dimension_numbers<[1], [0], [0], [1], [0, 0, 1, 1], [], []>} : vector<8x32xf32>, vector<32x192xf32>, vector<8x192xf32> -> vector<8x192xf32>
    %4 = vector.extract_strided_slice %3 {offsets = [0, 0], sizes = [8, 64], strides = [1, 1]} : vector<8x192xf32> to vector<8x64xf32>
    %5 = vector.extract_strided_slice %3 {offsets = [0, 64], sizes = [8, 64], strides = [1, 1]} : vector<8x192xf32> to vector<8x64xf32>
    %6 = vector.extract_strided_slice %3 {offsets = [0, 128], sizes = [8, 64], strides = [1, 1]} : vector<8x192xf32> to vector<8x64xf32>
    %c0_4 = arith.constant 0 : index
    %c0_5 = arith.constant 0 : index
    %c0_6 = arith.constant 0 : index
    %7 = vector.load %arg3[%c0_4, %c0_5, %c0_6] : memref<1x1x8xf32, #tpu.memory_space<vmem>>, vector<1x1x8xf32>
    %8 = vector.shape_cast %7 : vector<1x1x8xf32> to vector<1x8xf32>
    %cst_7 = arith.constant 2.500000e-01 : f32
    %9 = vector.broadcast %cst_7 : f32 to vector<8x64xf32>
    %10 = arith.mulf %4, %9 : vector<8x64xf32>
    %11 = vector.extract_strided_slice %10 {offsets = [0, 0], sizes = [8, 16], strides = [1, 1]} : vector<8x64xf32> to vector<8x16xf32>
    %12 = vector.extract_strided_slice %5 {offsets = [0, 0], sizes = [8, 16], strides = [1, 1]} : vector<8x64xf32> to vector<8x16xf32>
    "tpu.trace_start"() <{level = 10 : i32, message = "qd,kd->qk"}> : () -> ()
    %cst_8 = arith.constant dense<0.000000e+00> : vector<8x8xf32>
    %13 = tpu.matmul %11, %12, %cst_8 {dimension_numbers = #tpu.dot_dimension_numbers<[1], [1], [0], [0], [0, 0, 1, 0], [], []>} : vector<8x16xf32>, vector<8x16xf32>, vector<8x8xf32> -> vector<8x8xf32>
    "tpu.trace_stop"() : () -> ()
    %14 = vector.broadcast %8 : vector<1x8xf32> to vector<8x8xf32>
    %15 = arith.addf %13, %14 : vector<8x8xf32>
    %cst_9 = arith.constant dense<0xFF800000> : vector<8xf32>
    %16 = vector.multi_reduction <maximumf>, %15, %cst_9 [1] : vector<8x8xf32> to vector<8xf32>
    %17 = vector.shape_cast %16 : vector<8xf32> to vector<8x1xf32>
    %18 = vector.broadcast %17 : vector<8x1xf32> to vector<8x8xf32>
    %19 = arith.subf %15, %18 : vector<8x8xf32>
    %20 = math.exp %19 : vector<8x8xf32>
    %cst_10 = arith.constant dense<0.000000e+00> : vector<8xf32>
    %21 = vector.multi_reduction <add>, %20, %cst_10 [1] : vector<8x8xf32> to vector<8xf32>
    %22 = vector.shape_cast %21 : vector<8xf32> to vector<8x1xf32>
    %23 = tpu.reciprocal %22 {approx = true} : vector<8x1xf32> -> vector<8x1xf32>
    %24 = vector.broadcast %23 : vector<8x1xf32> to vector<8x8xf32>
    %25 = arith.mulf %20, %24 : vector<8x8xf32>
    %26 = vector.extract_strided_slice %6 {offsets = [0, 0], sizes = [8, 16], strides = [1, 1]} : vector<8x64xf32> to vector<8x16xf32>
    %cst_11 = arith.constant dense<0.000000e+00> : vector<8x16xf32>
    %27 = tpu.matmul %25, %26, %cst_11 {dimension_numbers = #tpu.dot_dimension_numbers<[1], [0], [0], [1], [0, 0, 1, 1], [], []>} : vector<8x8xf32>, vector<8x16xf32>, vector<8x16xf32> -> vector<8x16xf32>
    %28 = vector.extract_strided_slice %10 {offsets = [0, 16], sizes = [8, 16], strides = [1, 1]} : vector<8x64xf32> to vector<8x16xf32>
    %29 = vector.extract_strided_slice %5 {offsets = [0, 16], sizes = [8, 16], strides = [1, 1]} : vector<8x64xf32> to vector<8x16xf32>
    "tpu.trace_start"() <{level = 10 : i32, message = "qd,kd->qk"}> : () -> ()
    %cst_12 = arith.constant dense<0.000000e+00> : vector<8x8xf32>
    %30 = tpu.matmul %28, %29, %cst_12 {dimension_numbers = #tpu.dot_dimension_numbers<[1], [1], [0], [0], [0, 0, 1, 0], [], []>} : vector<8x16xf32>, vector<8x16xf32>, vector<8x8xf32> -> vector<8x8xf32>
    "tpu.trace_stop"() : () -> ()
    %31 = vector.broadcast %8 : vector<1x8xf32> to vector<8x8xf32>
    %32 = arith.addf %30, %31 : vector<8x8xf32>
    %cst_13 = arith.constant dense<0xFF800000> : vector<8xf32>
    %33 = vector.multi_reduction <maximumf>, %32, %cst_13 [1] : vector<8x8xf32> to vector<8xf32>
    %34 = vector.shape_cast %33 : vector<8xf32> to vector<8x1xf32>
    %35 = vector.broadcast %34 : vector<8x1xf32> to vector<8x8xf32>
    %36 = arith.subf %32, %35 : vector<8x8xf32>
    %37 = math.exp %36 : vector<8x8xf32>
    %cst_14 = arith.constant dense<0.000000e+00> : vector<8xf32>
    %38 = vector.multi_reduction <add>, %37, %cst_14 [1] : vector<8x8xf32> to vector<8xf32>
    %39 = vector.shape_cast %38 : vector<8xf32> to vector<8x1xf32>
    %40 = tpu.reciprocal %39 {approx = true} : vector<8x1xf32> -> vector<8x1xf32>
    %41 = vector.broadcast %40 : vector<8x1xf32> to vector<8x8xf32>
    %42 = arith.mulf %37, %41 : vector<8x8xf32>
    %43 = vector.extract_strided_slice %6 {offsets = [0, 16], sizes = [8, 16], strides = [1, 1]} : vector<8x64xf32> to vector<8x16xf32>
    %cst_15 = arith.constant dense<0.000000e+00> : vector<8x16xf32>
    %44 = tpu.matmul %42, %43, %cst_15 {dimension_numbers = #tpu.dot_dimension_numbers<[1], [0], [0], [1], [0, 0, 1, 1], [], []>} : vector<8x8xf32>, vector<8x16xf32>, vector<8x16xf32> -> vector<8x16xf32>
    %45 = vector.extract_strided_slice %10 {offsets = [0, 32], sizes = [8, 16], strides = [1, 1]} : vector<8x64xf32> to vector<8x16xf32>
    %46 = vector.extract_strided_slice %5 {offsets = [0, 32], sizes = [8, 16], strides = [1, 1]} : vector<8x64xf32> to vector<8x16xf32>
    "tpu.trace_start"() <{level = 10 : i32, message = "qd,kd->qk"}> : () -> ()
    %cst_16 = arith.constant dense<0.000000e+00> : vector<8x8xf32>
    %47 = tpu.matmul %45, %46, %cst_16 {dimension_numbers = #tpu.dot_dimension_numbers<[1], [1], [0], [0], [0, 0, 1, 0], [], []>} : vector<8x16xf32>, vector<8x16xf32>, vector<8x8xf32> -> vector<8x8xf32>
    "tpu.trace_stop"() : () -> ()
    %48 = vector.broadcast %8 : vector<1x8xf32> to vector<8x8xf32>
    %49 = arith.addf %47, %48 : vector<8x8xf32>
    %cst_17 = arith.constant dense<0xFF800000> : vector<8xf32>
    %50 = vector.multi_reduction <maximumf>, %49, %cst_17 [1] : vector<8x8xf32> to vector<8xf32>
    %51 = vector.shape_cast %50 : vector<8xf32> to vector<8x1xf32>
    %52 = vector.broadcast %51 : vector<8x1xf32> to vector<8x8xf32>
    %53 = arith.subf %49, %52 : vector<8x8xf32>
    %54 = math.exp %53 : vector<8x8xf32>
    %cst_18 = arith.constant dense<0.000000e+00> : vector<8xf32>
    %55 = vector.multi_reduction <add>, %54, %cst_18 [1] : vector<8x8xf32> to vector<8xf32>
    %56 = vector.shape_cast %55 : vector<8xf32> to vector<8x1xf32>
    %57 = tpu.reciprocal %56 {approx = true} : vector<8x1xf32> -> vector<8x1xf32>
    %58 = vector.broadcast %57 : vector<8x1xf32> to vector<8x8xf32>
    %59 = arith.mulf %54, %58 : vector<8x8xf32>
    %60 = vector.extract_strided_slice %6 {offsets = [0, 32], sizes = [8, 16], strides = [1, 1]} : vector<8x64xf32> to vector<8x16xf32>
    %cst_19 = arith.constant dense<0.000000e+00> : vector<8x16xf32>
    %61 = tpu.matmul %59, %60, %cst_19 {dimension_numbers = #tpu.dot_dimension_numbers<[1], [0], [0], [1], [0, 0, 1, 1], [], []>} : vector<8x8xf32>, vector<8x16xf32>, vector<8x16xf32> -> vector<8x16xf32>
    %62 = vector.extract_strided_slice %10 {offsets = [0, 48], sizes = [8, 16], strides = [1, 1]} : vector<8x64xf32> to vector<8x16xf32>
    %63 = vector.extract_strided_slice %5 {offsets = [0, 48], sizes = [8, 16], strides = [1, 1]} : vector<8x64xf32> to vector<8x16xf32>
    "tpu.trace_start"() <{level = 10 : i32, message = "qd,kd->qk"}> : () -> ()
    %cst_20 = arith.constant dense<0.000000e+00> : vector<8x8xf32>
    %64 = tpu.matmul %62, %63, %cst_20 {dimension_numbers = #tpu.dot_dimension_numbers<[1], [1], [0], [0], [0, 0, 1, 0], [], []>} : vector<8x16xf32>, vector<8x16xf32>, vector<8x8xf32> -> vector<8x8xf32>
    "tpu.trace_stop"() : () -> ()
    %65 = vector.broadcast %8 : vector<1x8xf32> to vector<8x8xf32>
    %66 = arith.addf %64, %65 : vector<8x8xf32>
    %cst_21 = arith.constant dense<0xFF800000> : vector<8xf32>
    %67 = vector.multi_reduction <maximumf>, %66, %cst_21 [1] : vector<8x8xf32> to vector<8xf32>
    %68 = vector.shape_cast %67 : vector<8xf32> to vector<8x1xf32>
    %69 = vector.broadcast %68 : vector<8x1xf32> to vector<8x8xf32>
    %70 = arith.subf %66, %69 : vector<8x8xf32>
    %71 = math.exp %70 : vector<8x8xf32>
    %cst_22 = arith.constant dense<0.000000e+00> : vector<8xf32>
    %72 = vector.multi_reduction <add>, %71, %cst_22 [1] : vector<8x8xf32> to vector<8xf32>
    %73 = vector.shape_cast %72 : vector<8xf32> to vector<8x1xf32>
    %74 = tpu.reciprocal %73 {approx = true} : vector<8x1xf32> -> vector<8x1xf32>
    %75 = vector.broadcast %74 : vector<8x1xf32> to vector<8x8xf32>
    %76 = arith.mulf %71, %75 : vector<8x8xf32>
    %77 = vector.extract_strided_slice %6 {offsets = [0, 48], sizes = [8, 16], strides = [1, 1]} : vector<8x64xf32> to vector<8x16xf32>
    %cst_23 = arith.constant dense<0.000000e+00> : vector<8x16xf32>
    %78 = tpu.matmul %76, %77, %cst_23 {dimension_numbers = #tpu.dot_dimension_numbers<[1], [0], [0], [1], [0, 0, 1, 1], [], []>} : vector<8x8xf32>, vector<8x16xf32>, vector<8x16xf32> -> vector<8x16xf32>
    %79 = tpu.concatenate %27, %44, %61, %78 in 1 : vector<8x16xf32>, vector<8x16xf32>, vector<8x16xf32>, vector<8x16xf32> -> vector<8x64xf32>
    %c0_24 = arith.constant 0 : index
    %c0_25 = arith.constant 0 : index
    %80 = vector.load %arg4[%c0_24, %c0_25] : memref<64x32xf32, #tpu.memory_space<vmem>>, vector<64x32xf32>
    %cst_26 = arith.constant dense<0.000000e+00> : vector<8x32xf32>
    %81 = tpu.matmul %79, %80, %cst_26 {dimension_numbers = #tpu.dot_dimension_numbers<[1], [0], [0], [1], [0, 0, 1, 1], [], []>} : vector<8x64xf32>, vector<64x32xf32>, vector<8x32xf32> -> vector<8x32xf32>
    %c0_27 = arith.constant 0 : index
    %c0_28 = arith.constant 0 : index
    %82 = vector.load %arg5[%c0_27, %c0_28] : memref<1x32xf32, #tpu.memory_space<vmem>>, vector<1x32xf32>
    %83 = vector.broadcast %82 : vector<1x32xf32> to vector<8x32xf32>
    %84 = arith.addf %81, %83 : vector<8x32xf32>
    %c0_29 = arith.constant 0 : index
    %c0_30 = arith.constant 0 : index
    %c0_31 = arith.constant 0 : index
    %85 = vector.load %arg6[%c0_29, %c0_30, %c0_31] : memref<1x8x32xf32, #tpu.memory_space<vmem>>, vector<1x8x32xf32>
    %86 = vector.shape_cast %85 : vector<1x8x32xf32> to vector<8x32xf32>
    %87 = vector.shape_cast %84 : vector<8x32xf32> to vector<1x8x32xf32>
    tpu.vector_store %arg6[%c0_29, %c0_30, %c0_31], %87 {strides = array<i32>} : memref<1x8x32xf32, #tpu.memory_space<vmem>>, vector<1x8x32xf32>,
    return
  }
  func.func @transform_0(%arg0: i32) -> (i32, i32, i32) {
    %c0_i32 = arith.constant 0 : i32
    %c0_i32_0 = arith.constant 0 : i32
    %c0_i32_1 = arith.constant 0 : i32
    return %arg0, %c0_i32, %c0_i32_0 : i32, i32, i32
  }
  func.func @transform_1(%arg0: i32) -> (i32, i32) {
    %c0_i32 = arith.constant 0 : i32
    %c0_i32_0 = arith.constant 0 : i32
    %c0_i32_1 = arith.constant 0 : i32
    return %c0_i32, %c0_i32_0 : i32, i32
  }
  func.func @transform_2(%arg0: i32) -> (i32, i32, i32) {
    %c0_i32 = arith.constant 0 : i32
    %c0_i32_0 = arith.constant 0 : i32
    %c0_i32_1 = arith.constant 0 : i32
    return %arg0, %c0_i32, %c0_i32_0 : i32, i32, i32
  }
  func.func @transform_3(%arg0: i32) -> (i32, i32) {
    %c0_i32 = arith.constant 0 : i32
    %c0_i32_0 = arith.constant 0 : i32
    %c0_i32_1 = arith.constant 0 : i32
    return %c0_i32, %c0_i32_0 : i32, i32
  }
  func.func @transform_4(%arg0: i32) -> (i32, i32) {
    %c0_i32 = arith.constant 0 : i32
    %c0_i32_0 = arith.constant 0 : i32
    %c0_i32_1 = arith.constant 0 : i32
    return %c0_i32, %c0_i32_0 : i32, i32
  }
  func.func @transform_5(%arg0: i32) -> (i32, i32, i32) {
    %c0_i32 = arith.constant 0 : i32
    %c0_i32_0 = arith.constant 0 : i32
    %c0_i32_1 = arith.constant 0 : i32
    return %arg0, %c0_i32, %c0_i32_0 : i32, i32, i32
  }
}

</mosaic_0001>

<bundles_post_ra>
// kernel: tpu_custom_call.1
= control target key start
LH: loop header
LB: loop body
LE: loop exit
PB: predicated region body
PF: predicated region fallthrough
CT: control target
= control target key end

     0   :  { %10 = vsyncpa [#allocation3], 0  ;;  %s1701_s0 = inlined_call_operand.vmem [shape: f32[2,8,32], index: 0, kind: input, shape index: {}]   ;;  %s1702_s1 = inlined_call_operand.vmem [shape: f32[32,192], index: 1, kind: input, shape index: {}]   ;;  %s1703_s2 = inlined_call_operand.vmem [shape: f32[2,1,8], index: 2, kind: input, shape index: {}]   ;;  %s1704_s3 = inlined_call_operand.vmem [shape: f32[64,32], index: 3, kind: input, shape index: {}]   ;;  %s1705_s4 = inlined_call_operand.vmem [shape: f32[1,32], index: 4, kind: input, shape index: {}]   ;;  %s1706_s5 = inlined_call_operand.hbm [shape: f32[2,8,32], index: 5, kind: output, shape index: {}]  }
   0x1   :  { %12 = vsyncpa [#allocation3 + $0x1], 0  ;;  %s1474_s18 = smov 0   ;;  %s1476_s19 = smov 0  }
   0x2   :  { %s1478_s20 = smov 0   ;;  %s1480_s21 = smov 0  }
   0x3 LB: > { %s1495_s22 = sadd.s32 4294967295, %s1431_s21   ;;  %s1174_s23 = sadd.s32 4294967294, %s1431_s21   ;;  %s1431_s21 = sphi %s1480_s21, %s1712_s21   ;;  %s1427_s20 = sphi %s1478_s20, %s1711_s20   ;;  %s1423_s19 = sphi %s1476_s19, %s1710_s19   ;;  %s1419_s18 = sphi %s1474_s18, %s1709_s18  }
   0x4   : > { %s1499_s24 = sadd.s32 1, %s1431_s21   ;;  %s140_s25 = sadd.s32 1, %s1427_s20 }
   0x5   : > { %s137_s26 = ssub.s32 %s1431_s21, %s1499_s24  ;;  %p150_p0 = scmp.ne.s32.totalorder %s1427_s20, %s1423_s19 }
   0x6   : > { %p138_p1 = scmp.eq.s32.totalorder %s137_s26, 0  ;;  %p151_p2 = scmp.eq.s32.totalorder %s1495_s22, 1 }
   0x7   : > { %p156_p3 = scmp.ne.s32.totalorder %s1423_s19, %s1419_s18  ;;  %p157_p4 = scmp.eq.s32.totalorder %s1174_s23, 1 }
   0x8   : > { %s1510_s27 = scalar_select %p138_p1, %s1427_s20, %s140_s25  }
   0x9   : > { %p1512_p5 = por %p151_p2, %p150_p0  ;;  %p1516_p6 = por %p157_p4, %p156_p3 }
   0xa   : > { %p1177_p7 = scmp.ge.s32.totalorder %s1431_s21, 1  ;;  %p197_p8 = scmp.lt.s32.totalorder %s1431_s21, 3 }
   0xc   : > { %p198_p9 = pnand %p1177_p7, %p197_p8 }
   0xd   : > { %v236_v0 = vld [vmem:[%s1702_s1 + $0x8] sm:$0xff] (!%p198_p9)  ;;  %v238_v1 = vld [vmem:[%s1702_s1 + $0x18] sm:$0xff] (!%p198_p9)  ;;  %v235_v2 = vld [vmem:[%s1702_s1] sm:$0xff] (!%p198_p9)  ;;  %p227_p10 = scmp.lt.s32.totalorder (!%p198_p9), %s1495_s22, 1  ;;  %v1433_v7 = vmov (!%p198_p9), 0.0   ;;  %vm243_vm0 = vcmask (!%p198_p9), 261120  }
   0xe   : > { %201 = sbr.rel (%p198_p9) target bundleno = 1497 (0x5d9), region = 40  ;;  %v1284_v3 = vpack.c.bf16 (!%p198_p9), %v238_v1, %v236_v0  ;;  %v237_v4 = vld [vmem:[%s1702_s1 + $0x10] sm:$0xff] (!%p198_p9)  ;;  %v240_v5 = vld [vmem:[%s1702_s1 + $0x28] sm:$0xff] (!%p198_p9)  ;;  %v242_v6 = vld [vmem:[%s1702_s1 + $0x38] sm:$0xff] (!%p198_p9)  ;;  %311 = vmatprep.mubr.f32.mxu1 (!%p198_p9), %v1433_v7  ;;  %1235 = vmatprep.subr.mxu0 (!%p198_p9), %v1433_v7  ;;  %vm1434_vm1 = vmmov (!%p198_p9), 0   ;;  %s1435_s10 = smov (!%p198_p9), 64  }
   0xf   : > { %v1286_v8 = vpack.c.bf16 (!%p198_p9), %v237_v4, %v235_v2  ;;  %v1288_v9 = vpack.c.bf16 (!%p198_p9), %v242_v6, %v240_v5  ;;  %v239_v10 = vld [vmem:[%s1702_s1 + $0x20] sm:$0xff] (!%p198_p9)  ;;  %v241_v11 = vld [vmem:[%s1702_s1 + $0x30] sm:$0xff] (!%p198_p9)  ;;  %1237 = vmatprep.mubr.msk.f32.mxu0 (!%p198_p9), %vm1434_vm1, %v1433_v7  ;;  %s1436_s11 = smov (!%p198_p9), 112   ;;  %s1437_s12 = smov (!%p198_p9), 48   ;;  %vm329_vm2 = vcmask (!%p198_p9), 130048   ;;  %vm405_vm3 = vcmask (!%p198_p9), 64512  }
  0x10   : > { %1285 = vmatprep.subr.bf16.mxu1 (!%p198_p9), %v1284_v3  ;;  %v1290_v12 = vpack.c.bf16 (!%p198_p9), %v241_v11, %v239_v10  ;;  %s1438_s13 = smov (!%p198_p9), 32   ;;  %s1439_s14 = smov (!%p198_p9), 96   ;;  %vm1000_vm4 = vcmask (!%p198_p9), 392192   ;;  %vm1017_vm5 = vcmask (!%p198_p9), 523264  }
  0x11   : > { %1287 = vmatpush1.bf16.msra.mxu1 (!%p198_p9), %v1286_v8  ;;  %s1440_s15 = smov (!%p198_p9), 16   ;;  %s1441_s16 = smov (!%p198_p9), 80  }
  0x12   : > { %1289 = vmatprep.subr.bf16.mxu1 (!%p198_p9), %v1288_v9 }
  0x15   : > { %s1550_s30 = scalar_select %p227_p10, %s1495_s22, 1  ;;  %1291 = vmatpush1.bf16.msra.mxu1 %v1290_v12 }
  0x16   : > { %1225 = vmatprep.subr.mxu1 %v1433_v7 }
  0x17   : > { %s1179_s6 = sshll.u32 %s1550_s30, 3  ;;  %s233_s25 = scalar_lea.vmem %s1703_s2, %s1550_s30 }
  0x18   : > { %s230_s9 = scalar_lea.vmem %s1701_s0, %s1179_s6  ;;  %v1181_v24 = vld [vmem:[%s233_s25] ss:$0 sm:$0xff] }
  0x19   : > { %v234_v13 = vld [vmem:[%s230_s9] sm:$0xff] }
  0x1a   : > { %1180 = vmatmul.mubr.msk.f32.vlgmr.msra.gmra.mrb[0].mxu1 %vm243_vm0, %v234_v13  ;;  %v1002_v13 = vld [vmem:[%s1704_s3] sm:$0xff] }
  0x1b   : > { %1227 = vmatprep.mubr.msk.f32.mxu1 %vm1434_vm1, %v1433_v7 }
  0xed   : > { %v313_v14 = vpop.f32.mrb[0].mxu1 }
  0xee   : > { %327 = vrot.lane.b32.xlu0 %v313_v14, %s1435_s10  ;;  %v1562_v15 = vpop.f32.mrb[1].mxu1  ;;  %v319_v16 = vmul.f32 0.25, %v313_v14 }
  0xf0   : > { %490 = vrot.lane.b32.xlu1 %v319_v16, %s1436_s11 }
  0xf2   : > { %492 = vrot.lane.b32.xlu0 %v313_v14, %s1437_s12 }
  0xf4   : > { %658 = vrot.lane.b32.xlu1 %v313_v14, %s1438_s13 }
  0xf6   : > { %656 = vrot.lane.b32.xlu0 %v319_v16, %s1439_s14 }
  0xf8   : > { %823 = vrot.lane.b32.xlu1 %v313_v14, %s1440_s15  ;;  %v1003_v14 = vld [vmem:[%s1704_s3 + $0x8] sm:$0xff] }
  0xfa   : > { %821 = vrot.lane.b32.xlu0 %v319_v16, %s1441_s16 }
 0x160   : > { %v328_v17 = vpop.permute.xlu0 %327 }
 0x161   : > { %1226 = vmatpush3.xpose.msk.msra.mxu1 %vm329_vm2, %v328_v17  ;;  %v1005_v17 = vld [vmem:[%s1704_s3 + $0x18] sm:$0xff] }
 0x162   : > { %v491_v18 = vpop.permute.xlu1 %490  ;;  %1230 = vmatprep.subr.mxu1 %v1433_v7 }
 0x164   : > { %v493_v19 = vpop.permute.xlu0 %492  ;;  %1228 = vmatmul.mubr.msk.f32.vlgmr.msra.gmra.mrb[2].mxu1 %vm329_vm2, %v319_v16  ;;  %v1293_v16 = vpack.c.bf16 %v1003_v14, %v1002_v13 }
 0x165   : > { %1231 = vmatpush3.msra.mxu1 %v1562_v15  ;;  %1236 = vmatpush3.xpose.msk.msra.mxu0 %vm329_vm2, %v493_v19 }
 0x166   : > { %v659_v20 = vpop.permute.xlu1 %658  ;;  %1245 = vmatprep.subr.mxu0 %v1433_v7  ;;  %1232 = vmatprep.mubr.msk.f32.mxu1 %vm1434_vm1, %v1433_v7 }
 0x167   : > { %1240 = vmatprep.subr.mxu1 %v1433_v7 }
 0x168   : > { %1238 = vmatmul.mubr.msk.f32.vlgmr.msra.gmra.mrb[0].mxu0 %vm329_vm2, %v491_v18  ;;  %v657_v21 = vpop.permute.xlu0 %656 }
 0x169   : > { %1246 = vmatpush3.xpose.msk.msra.mxu0 %vm329_vm2, %v659_v20  ;;  %1247 = vmatprep.mubr.msk.f32.mxu0 %vm1434_vm1, %v1433_v7  ;;  %v1006_v20 = vld [vmem:[%s1704_s3 + $0x20] sm:$0xff] }
 0x16a   : > { %1255 = vmatprep.subr.mxu0 %v1433_v7  ;;  %v824_v22 = vpop.permute.xlu1 %823 }
 0x16c   : > { %1248 = vmatmul.mubr.msk.f32.vlgmr.msra.gmra.mrb[2].mxu0 %vm329_vm2, %v657_v21  ;;  %v822_v23 = vpop.permute.xlu0 %821  ;;  %v1007_v21 = vld [vmem:[%s1704_s3 + $0x28] sm:$0xff] }
 0x16d   : > { %1256 = vmatpush3.xpose.msk.msra.mxu0 %vm329_vm2, %v824_v22  ;;  %1257 = vmatprep.mubr.msk.f32.mxu0 %vm1434_vm1, %v1433_v7 }
 0x170   : > { %1258 = vmatmul.mubr.msk.f32.vlgmr.msra.gmra.mrb[4].mxu0 %vm329_vm2, %v822_v23  ;;  %v1299_v23 = vpack.c.bf16 %v1007_v21, %v1006_v20 }
 0x171   : > { %1281 = vmatprep.mubr.msk.f32.mxu0 %vm1434_vm1, %v1433_v7 }
 0x237   : > { %v401_v25 = vpop.f32.mrb[2].mxu1 }
 0x238   : > { %v402_v26 = vadd.f32 %v1181_v24, %v401_v25  ;;  %v1229_v27 = vpop.f32.mrb[3].mxu1  ;;  %v1008_v25 = vld [vmem:[%s1704_s3 + $0x30] sm:$0xff] }
 0x23a   : > { %v406_v28 = vsel %vm405_vm3, %v402_v26, -inf }
 0x23b   : > { %v564_v29 = vpop.f32.mrb[0].mxu0  ;;  %407 = vmax.xlane.f32.xlu1 %v406_v28 }
 0x23c   : > { %v565_v30 = vadd.f32 %v1181_v24, %v564_v29  ;;  %v1239_v31 = vpop.f32.mrb[1].mxu0 }
 0x23e   : > { %v568_v32 = vsel %vm405_vm3, %v565_v30, -inf }
 0x23f   : > { %569 = vmax.xlane.f32.xlu0 %v568_v32  ;;  %v730_v33 = vpop.f32.mrb[2].mxu0 }
 0x240   : > { %v731_v34 = vadd.f32 %v1181_v24, %v730_v33  ;;  %v1249_v35 = vpop.f32.mrb[3].mxu0 }
 0x242   : > { %v734_v36 = vsel %vm405_vm3, %v731_v34, -inf }
 0x243   : > { %735 = vmax.xlane.f32.xlu0 %v734_v36  ;;  %v895_v37 = vpop.f32.mrb[4].mxu0 }
 0x244   : > { %v896_v38 = vadd.f32 %v1181_v24, %v895_v37  ;;  %v1259_v39 = vpop.f32.mrb[5].mxu0 }
 0x245   : > { %v1194_v39 = vld [vmem:[%s1705_s4] ss:$0 sm:$0xff] }
 0x246   : > { %v899_v40 = vsel %vm405_vm3, %v896_v38, -inf }
 0x247   : > { %900 = vmax.xlane.f32.xlu1 %v899_v40 }
 0x2c8   : > { %v408_v41 = vpop.xlane.xlu1 %407 }
 0x2c9   : > { %v409_v42 = vsub.f32 %v402_v26, %v408_v41  ;;  %v1009_v26 = vld [vmem:[%s1704_s3 + $0x38] sm:$0xff] }
 0x2ca   : > { %v1302_v28 = vpack.c.bf16 %v1009_v26, %v1008_v25 }
 0x2cb   : > { %v410_v43 = vmul.f32 1.442695, %v409_v42 }
 0x2cc   : > { %v570_v44 = vpop.xlane.xlu0 %569 }
 0x2cd   : > { %1353 = vpow2.f32 %v410_v43  ;;  %v571_v45 = vsub.f32 %v565_v30, %v570_v44 }
 0x2cf   : > { %v572_v46 = vmul.f32 1.442695, %v571_v45 }
 0x2d0   : > { %v736_v47 = vpop.xlane.xlu0 %735 }
 0x2d1   : > { %1355 = vpow2.f32 %v572_v46  ;;  %v737_v48 = vsub.f32 %v731_v34, %v736_v47 }
 0x2d3   : > { %v738_v49 = vmul.f32 1.442695, %v737_v48 }
 0x2d4   : > { %v901_v56 = vpop.xlane.xlu1 %900 }
 0x2d5   : > { %1357 = vpow2.f32 %v738_v49  ;;  %v902_v57 = vsub.f32 %v896_v38, %v901_v56 }
 0x2d7   : > { %v1354_v50 = vpop.eup %1353  ;;  %v903_v58 = vmul.f32 1.442695, %v902_v57 }
 0x2d8   : > { %v412_v51 = vsel %vm405_vm3, %v1354_v50, 0.0 }
 0x2d9   : > { %413 = vadd.xlane.f32.xlu0 %v412_v51  ;;  %1359 = vpow2.f32 %v903_v58 }
 0x2db   : > { %v1356_v52 = vpop.eup %1355 }
 0x2dc   : > { %v574_v53 = vsel %vm405_vm3, %v1356_v52, 0.0 }
 0x2dd   : > { %575 = vadd.xlane.f32.xlu1 %v574_v53 }
 0x2df   : > { %v1358_v54 = vpop.eup %1357 }
 0x2e0   : > { %v740_v55 = vsel %vm405_vm3, %v1358_v54, 0.0 }
 0x2e1   : > { %741 = vadd.xlane.f32.xlu0 %v740_v55 }
 0x2e3   : > { %v1360_v59 = vpop.eup %1359 }
 0x2e4   : > { %v905_v60 = vsel %vm405_vm3, %v1360_v59, 0.0 }
 0x2ee   : > { %745 = vrot.lane.b32.xlu1 %v1562_v15, %s1439_s14 }
 0x2f7   : > { %580 = vrot.lane.b32.xlu0 %v1562_v15, %s1436_s11 }
 0x312   : > { %906 = vadd.xlane.f32.xlu1 %v905_v60 }
 0x323   : > { %910 = vrot.lane.b32.xlu1 %v1562_v15, %s1441_s16  ;;  %v1442_v15 = vmov 0.0|0.0  }
 0x324   : > { %1292 = vmatprep.subr.bf16.mxu0 %v1442_v15 }
 0x325   : > { %1294 = vmatpush3.bf16.msra.mxu0 %v1293_v16 }
 0x326   : > { %1295 = vmatprep.subr.bf16.mxu0 %v1442_v15 }
 0x366   : > { %v414_v61 = vpop.xlane.xlu0 %413 }
 0x367   : > { %1361 = vrcp.f32 %v414_v61 }
 0x36a   : > { %v576_v62 = vpop.xlane.xlu1 %575 }
 0x36b   : > { %1363 = vrcp.f32 %v576_v62 }
 0x36e   : > { %v742_v63 = vpop.xlane.xlu0 %741  ;;  %v746_v5 = vpop.permute.xlu1 %745 }
 0x36f   : > { %1365 = vrcp.f32 %v742_v63 }
 0x371   : > { %v1362_v0 = vpop.eup %1361 }
 0x372   : > { %v416_v1 = vmul.f32 %v1362_v0, %v1354_v50  ;;  %v581_v2 = vpop.permute.xlu0 %580 }
 0x374   : > { %1233 = vmatmul.mubr.msk.f32.vlgmr.msra.gmra.mrb[4].mxu1 %vm405_vm3, %v416_v1 }
 0x375   : > { %v1364_v3 = vpop.eup %1363  ;;  %1241 = vmatpush3.msra.mxu1 %v581_v2  ;;  %1242 = vmatprep.mubr.msk.f32.mxu1 %vm1434_vm1, %v1433_v7 }
 0x376   : > { %v578_v4 = vmul.f32 %v1364_v3, %v1356_v52  ;;  %1250 = vmatprep.subr.mxu1 %v1433_v7 }
 0x378   : > { %1243 = vmatmul.mubr.msk.f32.vlgmr.msra.gmra.mrb[6].mxu1 %vm405_vm3, %v578_v4 }
 0x379   : > { %v1366_v6 = vpop.eup %1365  ;;  %1251 = vmatpush3.msra.mxu1 %v746_v5  ;;  %1252 = vmatprep.mubr.msk.f32.mxu1 %vm1434_vm1, %v1433_v7 }
 0x37a   : > { %v744_v8 = vmul.f32 %v1366_v6, %v1358_v54  ;;  %1260 = vmatprep.subr.mxu1 %v1433_v7 }
 0x37c   : > { %1253 = vmatmul.mubr.msk.f32.vlgmr.msra.gmra.mrb[8].mxu1 %vm405_vm3, %v744_v8 }
 0x37d   : > { %1262 = vmatprep.mubr.msk.f32.mxu1 %vm1434_vm1, %v1433_v7  ;;  %v1004_v7 = vld [vmem:[%s1704_s3 + $0x10] sm:$0xff] }
 0x37e   : > { %v1296_v18 = vpack.c.bf16 %v1005_v17, %v1004_v7 }
 0x380   : > { %1297 = vmatpush3.bf16.msra.mxu0 %v1296_v18 }
 0x381   : > { %1298 = vmatprep.subr.bf16.mxu0 %v1442_v15 }
 0x384   : > { %1300 = vmatpush3.bf16.msra.mxu0 %v1299_v23 }
 0x385   : > { %1301 = vmatprep.subr.bf16.mxu0 %v1442_v15 }
 0x388   : > { %1303 = vmatpush3.bf16.msra.mxu0 %v1302_v28 }
 0x39f   : > { %v907_v9 = vpop.xlane.xlu1 %906 }
 0x3a0   : > { %1367 = vrcp.f32 %v907_v9 }
 0x3a3   : > { %v911_v10 = vpop.permute.xlu1 %910 }
 0x3a4   : > { %1261 = vmatpush3.msra.mxu1 %v911_v10 }
 0x3aa   : > { %v1368_v11 = vpop.eup %1367 }
 0x3ab   : > { %v909_v12 = vmul.f32 %v1368_v11, %v1360_v59 }
 0x3ad   : > { %1263 = vmatmul.mubr.msk.f32.vlgmr.msra.gmra.mrb[10].mxu1 %vm405_vm3, %v909_v12 }
 0x447   : > { %v486_v19 = vpop.f32.mrb[4].mxu1 }
 0x448   : > { %v1234_v22 = vpop.f32.mrb[5].mxu1 }
 0x44b   : > { %v652_v24 = vpop.f32.mrb[6].mxu1 }
 0x44c   : > { %987 = vrot.lane.b32.xlu0 %v652_v24, %s1440_s15  ;;  %v1244_v27 = vpop.f32.mrb[7].mxu1 }
 0x44f   : > { %v817_v29 = vpop.f32.mrb[8].mxu1 }
 0x450   : > { %991 = vrot.lane.b32.xlu1 %v817_v29, %s1438_s13  ;;  %v1254_v30 = vpop.f32.mrb[9].mxu1  ;;  %s224_s13 = sand.u32 1, %s1423_s19  }
 0x451   : > { %s1178_s15 = sshll.u32 %s224_s13, 3  ;;  %s1093_s17 = scalar_lea.sflag [#allocation3], %s224_s13 }
 0x452   : > { %s226_s9 = scalar_lea.vmem [#allocation2], %s1178_s15 }
 0x453   : > { %s1106_s10 = sshll.u32 %s226_s9, 4  ;;  %s1660_s10 = int_to_ptr.vmem [resolvable:$true] %s1106_s10 }
 0x454   : > { %s1369_s23 = scalar_lea.vmem %s1660_s10, 128 }
 0x455   : > { %p1370_p11 = scmp.ne.s32.totalorder %s1660_s10, %s1369_s23 }
 0x457   : > { %p1371_p12 = pnand %p1370_p11, %p1512_p5 }
 0x459   : > { %p1372_p13 = pneg %p1371_p12 }
 0x480   : > { %v982_v31 = vpop.f32.mrb[10].mxu1 }
 0x481   : > { %995 = vrot.lane.b32.xlu0 %v982_v31, %s1437_s12  ;;  %v1264_v32 = vpop.f32.mrb[11].mxu1  ;;  %s1197_s12 = sshll.u32 %s1495_s22, 7  ;;  %s1443_s22 = smov [#allocation2]  }
 0x482   : > { %s1658_s16 = scalar_lea.hbm %s1706_s5, %s1197_s12  ;;  %s1373_s25 = sshll.u32 %s1443_s22, 4  ;;  %s1374_s25 = int_to_ptr.vmem [resolvable:$false] %s1373_s25 }
 0x483   : > { %s1375_s26 = scalar_lea.vmem %s1374_s25, 256  ;;  %p1376_p0 = scmp.lt.s32.totalorder %s1660_s10, %s1374_s25 }
 0x484   : > { %p1377_p1 = scmp.lt.s32.totalorder %s1375_s26, %s1369_s23 }
 0x486   : > { %p1378_p2 = por %p1377_p1, %p1376_p0 }
 0x488   : > { %p1379_p3 = pnand %p1378_p2, %p1372_p13 }
 0x4be   : > { %v988_v33 = vpop.permute.xlu0 %987 }
 0x4bf   : > { %v998_v35 = vsel %vm329_vm2, %v486_v19, %v988_v33 }
 0x4c2   : > { %v992_v34 = vpop.permute.xlu1 %991 }
 0x4c3   : > { %v999_v36 = vsel %vm243_vm0, %v998_v35, %v992_v34 }
 0x4f3   : > { %v996_v37 = vpop.permute.xlu0 %995 }
 0x4f4   : > { %v1001_v38 = vsel %vm1000_vm4, %v999_v36, %v996_v37 }
 0x4f5   : > { %1282 = vmatmul.mubr.msk.f32.vlgmr.msra.gmra.mrb[6].mxu0 %vm1017_vm5, %v1001_v38 }
 0x5c8   : > { %v1087_v40 = vpop.f32.mrb[6].mxu0 }
 0x5c9   : > { %v1088_v41 = vadd.f32 %v1194_v39, %v1087_v40  ;;  %v1283_v42 = vpop.f32.mrb[7].mxu0 }
 0x5cb   : > { %1091 = vst.msk [vmem:[%s226_s9] sm:$0xff] %vm243_vm0, %v1088_v41 }
 0x5cc   : > { %1382 = shalt.err (!%p1379_p3)
}
 0x5cd   : > { %s1383_s30 = scalar_lea.hbm %s1658_s16, 128  ;;  %s1387_s15 = scalar_lea.hbm %s1706_s5, 256 }
 0x5ce   : > { %p1384_p4 = scmp.ne.s32.totalorder %s1658_s16, %s1383_s30  ;;  %p1388_p9 = scmp.lt.u32.totalorder %s1658_s16, %s1706_s5 }
 0x5cf   : > { %p1389_p10 = scmp.lt.u32.totalorder %s1387_s15, %s1383_s30  ;;  %p1391_p12 = scmp.lt.u32.totalorder %s1383_s30, %s1658_s16 }
 0x5d0   : > { %p1385_p7 = pnand %p1384_p4, %p1512_p5 }
 0x5d1   : > { %p1390_p11 = por %p1389_p10, %p1388_p9 }
 0x5d2   : > { %p1386_p8 = pneg %p1385_p7 }
 0x5d3   : > { %p1392_p13 = por %p1391_p12, %p1390_p11 }
 0x5d5   : > { %p1393_p0 = pnand %p1392_p13, %p1386_p8 }
 0x5d7   : > { %1396 = shalt.err (!%p1393_p0)
}
 0x5d8   : > { %1304 = dma.vmem_to_hbm [thread:$0]  (%p1512_p5), %s1660_s10, 128, %s1658_s16, %s1093_s17  }
 0x5d9 PF: > { %p1310_p1 = scmp.ge.s32.totalorder %s1431_s21, 2  ;;  %s1118_s12 = sand.u32 1, %s1419_s18  }
 0x5da   : > { %s1119_s9 = scalar_lea.sflag [#allocation3], %s1118_s12 }
 0x5db   : > { %p1307_p2 = pnand %p1310_p1, %p1516_p6 }
 0x5dd   : > { %1414 = dma.done.wait (!%p1307_p2), %s1119_s9, 128  }
 0x5de   : > { %1416 = vsyncadd (!%p1307_p2), %s1119_s9, 4294967168  ;;  %p15_p3 = scmp.ge.s32.totalorder %s1499_s24, 4   ;;  %s1709_s18 = smov %s1423_s19 }
 0x5df   : > { %s1710_s19 = smov %s1427_s20  ;;  %s1711_s20 = smov %s1510_s27 }
 0x5e0   : > { %s1712_s21 = smov %s1499_s24  ;;  %17 = sbr.rel (!%p15_p3) target bundleno = 3 (0x3), region = 78 }
 0x5e7   :  { %1124 = vsyncpa [#allocation3], 1 }
 0x5e8   :  { %1126 = vsyncpa [#allocation3 + $0x1], 1 }

</bundles_post_ra>
